<compile_context>
chip_gen: v7x
topology: tpu7x:2x2x1
jax: 0.10.0
libtpu: 0.0.40
codegen_flags: <defaults>
</compile_context>

<pallas_src>
import functools
import math

import jax
import jax.numpy as jnp
from jax.experimental import pallas as pl
from jax.experimental.pallas import tpu as pltpu


# ----------------------------- helpers -----------------------------

_VMEM_LIMIT = 32 * 1024 * 1024  # >= v5e's 16 MiB default, <= every chip's physical VMEM


def _round_up(x, m):
    return (x + m - 1) // m * m


def _layernorm(x, eps=1e-6):
    # LayerNorm32(eps=1e-6); affine params are identity at init (initialize_weights
    # only touches nn.Linear), so omitting gamma/beta is numerically exact here.
    mu = jnp.mean(x, axis=-1, keepdims=True)
    var = jnp.mean(jnp.square(x - mu), axis=-1, keepdims=True)
    return (x - mu) * jax.lax.rsqrt(var + eps)


# ------------------- single-buffered constant-weight specs -------------------

_BUFFERED_OK = None  # lazily probed


def _buffered_ok():
    """Probe whether pl.Buffered(1) (single-buffered resident operands) works."""
    global _BUFFERED_OK
    if _BUFFERED_OK is None:
        try:
            def _probe(c_ref, x_ref, o_ref):
                o_ref[...] = x_ref[...] + c_ref[...]

            out = pl.pallas_call(
                _probe,
                out_shape=jax.ShapeDtypeStruct((16, 128), jnp.float32),
                grid=(2,),
                in_specs=[pl.BlockSpec((8, 128), lambda i: (0, 0),
                                       pipeline_mode=pl.Buffered(1)),
                          pl.BlockSpec((8, 128), lambda i: (i, 0))],
                out_specs=pl.BlockSpec((8, 128), lambda i: (i, 0)),
            )(jnp.ones((8, 128), jnp.float32), jnp.zeros((16, 128), jnp.float32))
            jax.block_until_ready(out)
            _BUFFERED_OK = bool(jnp.all(out == 1.0))
        except Exception:
            _BUFFERED_OK = False
    return _BUFFERED_OK


def _const_spec(shape):
    """Grid-invariant operand (weights / biases): VMEM-resident across the grid.
    Single-buffered when supported -> halves the weight VMEM footprint."""
    index_map = lambda *_: (0,) * len(shape)
    if _buffered_ok():
        return pl.BlockSpec(shape, index_map, pipeline_mode=pl.Buffered(1))
    return pl.BlockSpec(shape, index_map)


def _par(n_parallel, n_arbitrary=0):
    return pltpu.CompilerParams(
        dimension_semantics=("parallel",) * n_parallel + ("arbitrary",) * n_arbitrary,
        vmem_limit_bytes=_VMEM_LIMIT)


# ----------------------------- Pallas kernels -----------------------------

def _input_kernel(x_ref, w_ref, b_ref, pe_ref, o_ref):
    # h = input_layer(x) + pos_embedder(coords)   (pe_mode == 'ape')
    x = x_ref[...].astype(jnp.bfloat16)
    o_ref[...] = (jnp.dot(x, w_ref[...], preferred_element_type=jnp.float32)
                  + b_ref[...] + pe_ref[...])


def _ln_qkv_kernel(h_ref, wq_ref, wk_ref, wv_ref, bq_ref, bk_ref, bv_ref,
                   q_ref, k_ref, v_ref, *, scale, num_heads):
    # pre-LN + QKV projection, emitting (H, tm, hd) blocks directly (no XLA-side
    # head split later). Per-head weight slabs (C, hd) avoid any lane shuffles.
    xn = _layernorm(h_ref[...]).astype(jnp.bfloat16)
    for hh in range(num_heads):  # static unroll, H is small
        q = jnp.dot(xn, wq_ref[hh], preferred_element_type=jnp.float32) + bq_ref[hh]
        k = jnp.dot(xn, wk_ref[hh], preferred_element_type=jnp.float32) + bk_ref[hh]
        v = jnp.dot(xn, wv_ref[hh], preferred_element_type=jnp.float32) + bv_ref[hh]
        q_ref[hh] = (q * scale).astype(q_ref.dtype)   # 1/sqrt(hd) folded once
        k_ref[hh] = k.astype(k_ref.dtype)
        v_ref[hh] = v.astype(v_ref.dtype)


def _flash_attn_proj_kernel(h_ref, q_ref, k_ref, v_ref, pw_ref, pb_ref, o_ref,
                            m_sc, l_sc, acc_sc,
                            *, kv_len, block_k, need_mask, num_heads):
    # Online-softmax attention fused with the output projection and residual:
    #   o = h + concat_heads(softmax(q k^T) v) @ W_out + b_out
    # q/k/v blocks are (H, tile, hd); the output block is a lane-dense (tq, C) slab.
    kv_i = pl.program_id(1)

    @pl.when(kv_i == 0)
    def _():
        m_sc[...] = jnp.full_like(m_sc, -jnp.inf)
        l_sc[...] = jnp.zeros_like(l_sc)
        acc_sc[...] = jnp.zeros_like(acc_sc)

    s = jnp.einsum("hqd,hkd->hqk", q_ref[...], k_ref[...],
                   preferred_element_type=jnp.float32)            # f32 scores
    if need_mask:  # static: only emitted when N was padded
        # mask only depends on the kv lane position -> tiny (1,1,tk) iota, broadcast
        kv_pos = kv_i * block_k + jax.lax.broadcasted_iota(jnp.int32, (1, 1, block_k), 2)
        s = jnp.where(kv_pos < kv_len, s, -1e30)   # finite mask value (no NaN paths)

    m_prev = m_sc[...]
    m_new = jnp.maximum(m_prev, s.max(axis=-1, keepdims=True))
    alpha = jnp.exp(m_prev - m_new)
    p = jnp.exp(s - m_new)
    l_sc[...] = alpha * l_sc[...] + p.sum(axis=-1, keepdims=True)
    acc_sc[...] = alpha * acc_sc[...] + jnp.einsum(
        "hqk,hkd->hqd", p.astype(v_ref.dtype), v_ref[...],
        preferred_element_type=jnp.float32)
    m_sc[...] = m_new

    @pl.when(kv_i == pl.num_programs(1) - 1)
    def _():
        # Fused finalize: normalize (exact reciprocal), project per head with
        # (hd, C) weight slabs, add bias + residual -> lane-dense (tq, C) store.
        x = h_ref[...] + pb_ref[...]
        for hh in range(num_heads):  # static unroll
            attn_h = (acc_sc[hh] * (1.0 / l_sc[hh])).astype(jnp.bfloat16)
            x = x + jnp.dot(attn_h, pw_ref[hh], preferred_element_type=jnp.float32)
        o_ref[...] = x


def _ln_mlp_kernel(x_ref, w1_ref, b1_ref, w2_ref, b2_ref, o_ref, xn_sc):
    # x + MLP(LN(x)), with the hidden dim Cm tiled on an inner 'arbitrary' grid
    # axis so w1/w2 stream instead of being fully VMEM-resident.
    cm_i = pl.program_id(1)

    @pl.when(cm_i == 0)
    def _():
        x = x_ref[...]
        xn_sc[...] = _layernorm(x).astype(jnp.bfloat16)
        o_ref[...] = x + b2_ref[...]            # residual + final bias, accumulate below

    mid = jnp.dot(xn_sc[...], w1_ref[...], preferred_element_type=jnp.float32) + b1_ref[...]
    mid = jax.nn.gelu(mid, approximate=True)     # tanh GELU (TRELLIS MLP)
    o_ref[...] += jnp.dot(mid.astype(jnp.bfloat16), w2_ref[...],
                          preferred_element_type=jnp.float32)


# ----------------------------- pallas_call wrappers -----------------------------

def input_proj(x, w, b, pe, tm):
    Np, Cin = x.shape
    C = w.shape[1]
    return pl.pallas_call(
        _input_kernel,
        out_shape=jax.ShapeDtypeStruct((Np, C), jnp.float32),
        grid=(Np // tm,),
        in_specs=[pl.BlockSpec((tm, Cin), lambda i: (i, 0)),
                  _const_spec((Cin, C)),
                  _const_spec((1, C)),
                  pl.BlockSpec((tm, C), lambda i: (i, 0))],
        out_specs=pl.BlockSpec((tm, C), lambda i: (i, 0)),
        compiler_params=_par(1),
    )(x, w, b, pe)


def ln_qkv(h, blk, tm, num_heads):
    Np, C = h.shape
    hd = C // num_heads
    scale = 1.0 / math.sqrt(hd)
    kernel = functools.partial(_ln_qkv_kernel, scale=scale, num_heads=num_heads)
    out_sd = jax.ShapeDtypeStruct((num_heads, Np, hd), jnp.bfloat16)
    qkv_spec = pl.BlockSpec((num_heads, tm, hd), lambda i: (0, i, 0))
    return pl.pallas_call(
        kernel,
        out_shape=(out_sd, out_sd, out_sd),
        grid=(Np // tm,),
        in_specs=[pl.BlockSpec((tm, C), lambda i: (i, 0)),
                  _const_spec((num_heads, C, hd)),
                  _const_spec((num_heads, C, hd)),
                  _const_spec((num_heads, C, hd)),
                  _const_spec((num_heads, 1, hd)),
                  _const_spec((num_heads, 1, hd)),
                  _const_spec((num_heads, 1, hd))],
        out_specs=(qkv_spec, qkv_spec, qkv_spec),
        compiler_params=_par(1),
    )(h, blk["wq"], blk["wk"], blk["wv"], blk["bq"], blk["bk"], blk["bv"])


def flash_attn_proj(h, q, k, v, proj_w, proj_b, *, tq, tk, n_valid):
    Np, C = h.shape
    H, _, hd = q.shape
    kernel = functools.partial(_flash_attn_proj_kernel, kv_len=n_valid,
                               block_k=tk, need_mask=(Np != n_valid), num_heads=H)
    flops = 4 * H * Np * Np * hd + 2 * Np * C * C
    bytes_acc = 3 * H * Np * hd * 2 + 2 * Np * C * 4 + C * C * 2 + C * 4
    return pl.pallas_call(
        kernel,
        out_shape=jax.ShapeDtypeStruct((Np, C), jnp.float32),
        grid=(Np // tq, Np // tk),
        in_specs=[pl.BlockSpec((tq, C), lambda qi, ki: (qi, 0)),        # residual h
                  pl.BlockSpec((H, tq, hd), lambda qi, ki: (0, qi, 0)),
                  pl.BlockSpec((H, tk, hd), lambda qi, ki: (0, ki, 0)),
                  pl.BlockSpec((H, tk, hd), lambda qi, ki: (0, ki, 0)),
                  _const_spec((H, hd, C)),                               # W_out per head
                  _const_spec((1, C))],                                  # b_out
        out_specs=pl.BlockSpec((tq, C), lambda qi, ki: (qi, 0)),
        scratch_shapes=[pltpu.VMEM((H, tq, 1), jnp.float32),
                        pltpu.VMEM((H, tq, 1), jnp.float32),
                        pltpu.VMEM((H, tq, hd), jnp.float32)],
        compiler_params=pltpu.CompilerParams(
            dimension_semantics=("parallel", "arbitrary"),
            vmem_limit_bytes=_VMEM_LIMIT),
        cost_estimate=pl.CostEstimate(flops=flops, transcendentals=H * Np * Np,
                                      bytes_accessed=bytes_acc),
    )(h, q, k, v, proj_w, proj_b)


def ln_mlp(x, blk, tm):
    Np, C = x.shape
    Cm = blk["w1"].shape[1]
    tcm = Cm if Cm <= 512 else (512 if Cm % 512 == 0 else Cm)
    return pl.pallas_call(
        _ln_mlp_kernel,
        out_shape=jax.ShapeDtypeStruct((Np, C), jnp.float32),
        grid=(Np // tm, Cm // tcm),
        in_specs=[pl.BlockSpec((tm, C), lambda i, j: (i, 0)),
                  pl.BlockSpec((C, tcm), lambda i, j: (0, j)),
                  pl.BlockSpec((1, tcm), lambda i, j: (0, j)),
                  pl.BlockSpec((tcm, C), lambda i, j: (j, 0)),
                  _const_spec((1, C))],
        out_specs=pl.BlockSpec((tm, C), lambda i, j: (i, 0)),
        scratch_shapes=[pltpu.VMEM((tm, C), jnp.bfloat16)],
        compiler_params=pltpu.CompilerParams(
            dimension_semantics=("parallel", "arbitrary"),
            vmem_limit_bytes=_VMEM_LIMIT),
    )(x, blk["w1"], blk["b1"], blk["w2"], blk["b2"])


# ----------------------------- plain-JAX glue -----------------------------

def ape_embed(coords_xyz, channels):
    """AbsolutePositionEmbedder(model_channels) on (N, 3) int coords."""
    N, D = coords_xyz.shape
    freq_dim = channels // D // 2
    freqs = 1.0 / (10000.0 ** (jnp.arange(freq_dim, dtype=jnp.float32) / freq_dim))
    flat = coords_xyz.reshape(-1).astype(jnp.float32)
    out = flat[:, None] * freqs[None, :]
    out = jnp.concatenate([jnp.sin(out), jnp.cos(out)], axis=-1)
    out = out.reshape(N, -1)
    if out.shape[1] < channels:
        out = jnp.concatenate(
            [out, jnp.zeros((N, channels - out.shape[1]), jnp.float32)], axis=-1)
    return out


def _xavier(key, fan_in, fan_out):
    bound = math.sqrt(6.0 / (fan_in + fan_out))
    return jax.random.uniform(key, (fan_in, fan_out), jnp.float32, -bound, bound)


def build_params(key, in_channels, model_channels, num_blocks, num_heads, mlp_ratio):
    C = model_channels
    H = num_heads
    hd = C // H
    Cm = int(C * mlp_ratio)
    wdt = jnp.bfloat16  # weights stored bf16: feed MXU directly, halve HBM traffic
    keys = jax.random.split(key, 1 + 6 * num_blocks)
    params = {
        "in_w": _xavier(keys[0], in_channels, C).astype(wdt),
        "in_b": jnp.zeros((1, C), jnp.float32),
        "blocks": [],
    }

    def head_w(k):  # xavier (C, C) -> per-head slabs (H, C, hd)
        return _xavier(k, C, C).reshape(C, H, hd).transpose(1, 0, 2).astype(wdt)

    for i in range(num_blocks):
        kq, kk, kv, kp, k1, k2 = keys[1 + 6 * i: 1 + 6 * (i + 1)]
        params["blocks"].append({
            "wq": head_w(kq), "bq": jnp.zeros((H, 1, hd), jnp.float32),
            "wk": head_w(kk), "bk": jnp.zeros((H, 1, hd), jnp.float32),
            "wv": head_w(kv), "bv": jnp.zeros((H, 1, hd), jnp.float32),
            "proj_w": _xavier(kp, C, C).reshape(H, hd, C).astype(wdt),
            "proj_b": jnp.zeros((1, C), jnp.float32),
            "w1": _xavier(k1, C, Cm).astype(wdt), "b1": jnp.zeros((1, Cm), jnp.float32),
            "w2": _xavier(k2, Cm, C).astype(wdt), "b2": jnp.zeros((1, C), jnp.float32),
        })
    return params


def sparse_transformer_base_forward(params, feats, coords, *, model_channels, num_heads):
    N = feats.shape[0]
    C = model_channels
    pe = ape_embed(coords[:, 1:], C)

    # Padding-aware token tile: choose from {256, 128} whichever wastes the least
    # padding (attention is O(Np^2)); small N rounds up to a multiple of 8.
    if N >= 128:
        tm = min((256, 128), key=lambda t: _round_up(N, t) - N)
    else:
        tm = _round_up(N, 8)
    Np = _round_up(N, tm)
    if Np != N:
        feats = jnp.pad(feats, ((0, Np - N), (0, 0)))
        pe = jnp.pad(pe, ((0, Np - N), (0, 0)))

    # h = input_layer(x) + pos_embedder(x.coords[:, 1:])   (pe_mode == 'ape')
    h = input_proj(feats, params["in_w"], params["in_b"], pe, tm)
    # h = h.type(self.dtype)  -> float32 residual stream (use_fp16=False)

    for blk in params["blocks"]:
        q, k, v = ln_qkv(h, blk, tm, num_heads)                   # (H, Np, hd) each
        h = flash_attn_proj(h, q, k, v, blk["proj_w"], blk["proj_b"],
                            tq=tm, tk=tm, n_valid=N)              # fused attn+proj+res
        h = ln_mlp(h, blk, tm)                                    # fused LN+MLP+res

    return h[:N]


# TODO(synk): only attn_mode='full' is implemented; 'shift_window' / 'shift_sequence' /
#             'shift_order' / 'swin' sparse serialization variants, pe_mode='rope',
#             qk_rms_norm, and use_checkpoint are not ported.
# TODO(synk): GELU uses the tanh approximation (TRELLIS MLP); if the reference uses
#             the exact erf GELU, outputs differ at the ~1e-3 level.

# ----------------------------- main -----------------------------

if __name__ == "__main__":
    N = 64                # number of active voxels (single batch)
    in_channels = 8
    model_channels = 32
    num_blocks = 2
    num_heads = 2         # head_dim = 16
    mlp_ratio = 4.0

    key = jax.random.PRNGKey(0)
    k_feats, k_coords, k_params = jax.random.split(key, 3)

    feats = jax.random.normal(k_feats, (N, in_channels), jnp.float32)
    coords_xyz = jax.random.randint(k_coords, (N, 3), 0, 16, jnp.int32)
    coords = jnp.concatenate([jnp.zeros((N, 1), jnp.int32), coords_xyz], axis=1)

    params = build_params(k_params, in_channels, model_channels, num_blocks,
                          num_heads, mlp_ratio)

    out = sparse_transformer_base_forward(
        params, feats, coords, model_channels=model_channels, num_heads=num_heads)
    jax.block_until_ready(out)
    assert out.shape == (N, model_channels) and out.dtype == jnp.float32
    assert bool(jnp.all(jnp.isfinite(out)))
    print("KERNEL_OK")
</pallas_src>

<mosaic_0001>
module attributes {stable_mosaic.version = 11 : i64} {
  func.func @_probe(%arg0: i32, %arg1: memref<8x128xf32, #tpu.memory_space<vmem>>, %arg2: memref<8x128xf32, #tpu.memory_space<vmem>>, %arg3: memref<8x128xf32, #tpu.memory_space<vmem>>) attributes {dimension_semantics = [#tpu.dimension_semantics<arbitrary>], iteration_bounds = array<i64: 2>, scalar_prefetch = 0 : i64, scratch_operands = 0 : i64, tpu.core_type = #tpu.core_type<tc>, window_params = [{pipeline_mode = #tpu.pipeline_mode<synchronous>, transform_indices = @transform_0, window_bounds = array<i64: 8, 128>}, {transform_indices = @transform_1, window_bounds = array<i64: 8, 128>}, {transform_indices = @transform_2, window_bounds = array<i64: 8, 128>}]} {
    %c0 = arith.constant 0 : index
    %c0_0 = arith.constant 0 : index
    %0 = vector.load %arg2[%c0, %c0_0] : memref<8x128xf32, #tpu.memory_space<vmem>>, vector<8x128xf32>
    %c0_1 = arith.constant 0 : index
    %c0_2 = arith.constant 0 : index
    %1 = vector.load %arg1[%c0_1, %c0_2] : memref<8x128xf32, #tpu.memory_space<vmem>>, vector<8x128xf32>
    %2 = arith.addf %0, %1 : vector<8x128xf32>
    %c0_3 = arith.constant 0 : index
    %c0_4 = arith.constant 0 : index
    %3 = vector.load %arg3[%c0_3, %c0_4] : memref<8x128xf32, #tpu.memory_space<vmem>>, vector<8x128xf32>
    tpu.vector_store %arg3[%c0_3, %c0_4], %2 {strides = array<i32>} : memref<8x128xf32, #tpu.memory_space<vmem>>, vector<8x128xf32>,
    return
  }
  func.func @transform_0(%arg0: i32) -> (i32, i32) {
    %c0_i32 = arith.constant 0 : i32
    %c0_i32_0 = arith.constant 0 : i32
    %c0_i32_1 = arith.constant 0 : i32
    return %c0_i32, %c0_i32_0 : i32, i32
  }
  func.func @transform_1(%arg0: i32) -> (i32, i32) {
    %c0_i32 = arith.constant 0 : i32
    %c0_i32_0 = arith.constant 0 : i32
    return %arg0, %c0_i32 : i32, i32
  }
  func.func @transform_2(%arg0: i32) -> (i32, i32) {
    %c0_i32 = arith.constant 0 : i32
    %c0_i32_0 = arith.constant 0 : i32
    return %arg0, %c0_i32 : i32, i32
  }
}

module attributes {stable_mosaic.version = 11 : i64} {
  func.func @_input_kernel(%arg0: i32, %arg1: memref<64x8xf32, #tpu.memory_space<vmem>>, %arg2: memref<8x32xbf16, #tpu.memory_space<vmem>>, %arg3: memref<1x32xf32, #tpu.memory_space<vmem>>, %arg4: memref<64x32xf32, #tpu.memory_space<vmem>>, %arg5: memref<64x32xf32, #tpu.memory_space<vmem>>) attributes {dimension_semantics = [#tpu.dimension_semantics<parallel>], iteration_bounds = array<i64: 1>, scalar_prefetch = 0 : i64, scratch_operands = 0 : i64, tpu.core_type = #tpu.core_type<tc>, window_params = [{transform_indices = @transform_0, window_bounds = array<i64: 64, 8>}, {pipeline_mode = #tpu.pipeline_mode<synchronous>, transform_indices = @transform_1, window_bounds = array<i64: 8, 32>}, {pipeline_mode = #tpu.pipeline_mode<synchronous>, transform_indices = @transform_2, window_bounds = array<i64: 1, 32>}, {transform_indices = @transform_3, window_bounds = array<i64: 64, 32>}, {transform_indices = @transform_4, window_bounds = array<i64: 64, 32>}]} {
    %c0 = arith.constant 0 : index
    %c0_0 = arith.constant 0 : index
    %0 = vector.load %arg1[%c0, %c0_0] : memref<64x8xf32, #tpu.memory_space<vmem>>, vector<64x8xf32>
    %1 = arith.truncf %0 : vector<64x8xf32> to vector<64x8xbf16>
    %c0_1 = arith.constant 0 : index
    %c0_2 = arith.constant 0 : index
    %2 = vector.load %arg2[%c0_1, %c0_2] : memref<8x32xbf16, #tpu.memory_space<vmem>>, vector<8x32xbf16>
    %cst = arith.constant dense<0.000000e+00> : vector<64x32xf32>
    %3 = tpu.matmul %1, %2, %cst {dimension_numbers = #tpu.dot_dimension_numbers<[1], [0], [0], [1], [0, 0, 1, 1], [], []>} : vector<64x8xbf16>, vector<8x32xbf16>, vector<64x32xf32> -> vector<64x32xf32>
    %c0_3 = arith.constant 0 : index
    %c0_4 = arith.constant 0 : index
    %4 = vector.load %arg3[%c0_3, %c0_4] : memref<1x32xf32, #tpu.memory_space<vmem>>, vector<1x32xf32>
    %5 = vector.broadcast %4 : vector<1x32xf32> to vector<64x32xf32>
    %6 = arith.addf %3, %5 : vector<64x32xf32>
    %c0_5 = arith.constant 0 : index
    %c0_6 = arith.constant 0 : index
    %7 = vector.load %arg4[%c0_5, %c0_6] : memref<64x32xf32, #tpu.memory_space<vmem>>, vector<64x32xf32>
    %8 = arith.addf %6, %7 : vector<64x32xf32>
    %c0_7 = arith.constant 0 : index
    %c0_8 = arith.constant 0 : index
    %9 = vector.load %arg5[%c0_7, %c0_8] : memref<64x32xf32, #tpu.memory_space<vmem>>, vector<64x32xf32>
    tpu.vector_store %arg5[%c0_7, %c0_8], %8 {strides = array<i32>} : memref<64x32xf32, #tpu.memory_space<vmem>>, vector<64x32xf32>,
    return
  }
  func.func @transform_0(%arg0: i32) -> (i32, i32) {
    %c0_i32 = arith.constant 0 : i32
    %c0_i32_0 = arith.constant 0 : i32
    return %arg0, %c0_i32 : i32, i32
  }
  func.func @transform_1(%arg0: i32) -> (i32, i32) {
    %c0_i32 = arith.constant 0 : i32
    %c0_i32_0 = arith.constant 0 : i32
    %c0_i32_1 = arith.constant 0 : i32
    return %c0_i32, %c0_i32_0 : i32, i32
  }
  func.func @transform_2(%arg0: i32) -> (i32, i32) {
    %c0_i32 = arith.constant 0 : i32
    %c0_i32_0 = arith.constant 0 : i32
    %c0_i32_1 = arith.constant 0 : i32
    return %c0_i32, %c0_i32_0 : i32, i32
  }
  func.func @transform_3(%arg0: i32) -> (i32, i32) {
    %c0_i32 = arith.constant 0 : i32
    %c0_i32_0 = arith.constant 0 : i32
    return %arg0, %c0_i32 : i32, i32
  }
  func.func @transform_4(%arg0: i32) -> (i32, i32) {
    %c0_i32 = arith.constant 0 : i32
    %c0_i32_0 = arith.constant 0 : i32
    return %arg0, %c0_i32 : i32, i32
  }
}

</mosaic_0001>

<bundles_post_ra>
// kernel: tpu_custom_call.1
= control target key start
LH: loop header
LB: loop body
LE: loop exit
PB: predicated region body
PF: predicated region fallthrough
CT: control target
= control target key end

     0   :  { %7 = vsyncpa [#allocation3], 0  ;;  %s692_s0 = inlined_call_operand.hbm [shape: f32[8,128], index: 0, kind: input, shape index: {}]   ;;  %s693_s1 = inlined_call_operand.hbm [shape: f32[16,128], index: 1, kind: input, shape index: {}]   ;;  %s694_s2 = inlined_call_operand.hbm [shape: f32[16,128], index: 2, kind: output, shape index: {}]  }
   0x1   :  { %8 = vsyncpa [#allocation6], 0 }
   0x2   :  { %10 = vsyncpa [#allocation6 + $0x1], 0 }
   0x3   :  { %11 = vsyncpa [#allocation4], 0 }
   0x4   :  { %13 = vsyncpa [#allocation4 + $0x1], 0  ;;  %s491_s9 = smov 0   ;;  %s493_s10 = smov 0  }
   0x5   :  { %s495_s11 = smov 0   ;;  %s497_s12 = smov 0  }
   0x6 LB: > { %s512_s13 = sadd.s32 4294967295, %s471_s12   ;;  %s272_s14 = sadd.s32 4294967294, %s471_s12   ;;  %s471_s12 = sphi %s497_s12, %s718_s12   ;;  %s467_s11 = sphi %s495_s11, %s717_s11   ;;  %s463_s10 = sphi %s493_s10, %s716_s10   ;;  %s459_s9 = sphi %s491_s9, %s715_s9  }
   0x7   : > { %p60_p0 = scmp.ne.s32.totalorder %s463_s10, %s459_s9  ;;  %p695_p1 = scmp.eq.s32.totalorder %s512_s13, 0 }
   0x8   : > { %p90_p3 = scmp.eq.s32.totalorder %s272_s14, 1  ;;  %p273_p5 = scmp.ge.s32.totalorder %s471_s12, 1 }
   0x9   : > { %p521_p4 = por %p695_p1, %p60_p0  ;;  %p97_p7 = scmp.lt.s32.totalorder %s471_s12, 3 }
   0xa   : > { %p526_p6 = por %p90_p3, %p60_p0  ;;  %s473_s18 = smov [#allocation2]  }
   0xb   : > { %s698_s15 = scalar_select %p521_p4, 1, 0 }
   0xc   : > { %s699_s16 = scalar_select %p526_p6, 1, 0 }
   0xd   : > { %p531_p8 = pnand %p273_p5, %p97_p7  ;;  %s110_s19 = sshll.u32 %s473_s18, 4  ;;  %s111_s19 = int_to_ptr.vmem [resolvable:$true] %s110_s19 }
   0xe   : > { %s539_s20 = sadd.s32 1, %s471_s12   ;;  %s47_s24 = sadd.s32 1, %s467_s11 }
   0xf   : > { %s700_s17 = scalar_select %p531_p8, 1, 0 }
  0x10   : > { %p294_p10 = pneg %p531_p8  ;;  %s44_s22 = ssub.s32 %s471_s12, %s539_s20 }
  0x11   : > { %p549_p12 = scmp.eq.s32.totalorder %s44_s22, 0  ;;  %s343_s27 = scalar_lea.hbm %s692_s0, 128 }
  0x12   : > { %p543_p11 = pnand %p294_p10, %p695_p1  ;;  %p344_p0 = scmp.ne.s32.totalorder %s692_s0, %s343_s27 }
  0x13   : > { %s702_s23 = scalar_select %p549_p12, 1, 0 }
  0x14   : > { %p345_p3 = pneg %p543_p11  ;;  %p350_p10 = scmp.lt.u32.totalorder %s343_s27, %s692_s0 }
  0x16   : > { %p346_p5 = pnand %p345_p3, %p344_p0 }
  0x18   : > { %p347_p7 = pneg %p346_p5 }
  0x1a   : > { %p352_p9 = pnand %p350_p10, %p347_p7 }
  0x1c   : > { %355 = shalt.err (!%p352_p9)
}
  0x1d   : > { %s356_s4 = scalar_lea.vmem %s111_s19, 128  ;;  %p364_p6 = scmp.lt.s32.totalorder %s111_s19, %s111_s19 }
  0x1e   : > { %p357_p1 = scmp.ne.s32.totalorder %s111_s19, %s356_s4  ;;  %p365_p4 = scmp.lt.s32.totalorder %s356_s4, %s356_s4 }
  0x20   : > { %p359_p2 = pnand %p357_p1, %p345_p3  ;;  %p366_p8 = por %p365_p4, %p364_p6 }
  0x22   : > { %p360_p13 = pneg %p359_p2 }
  0x24   : > { %p367_p12 = pnand %p366_p8, %p360_p13 }
  0x26   : > { %370 = shalt.err (!%p367_p12)
}
  0x27   : > { %297 = dma.hbm_to_vmem [thread:$0]  (!%p543_p11), %s692_s0, 128, %s111_s19, [#allocation3]  }
  0x28   : > { %p703_p1 = scmp.ne.s32.totalorder %s702_s23, 0  ;;  %p55_p2 = scmp.eq.s32.totalorder %s471_s12, 0 }
  0x29   : > { %p704_p4 = scmp.ne.s32.totalorder %s467_s11, %s463_s10  ;;  %p705_p6 = scmp.eq.s32.totalorder %s512_s13, 1 }
  0x2a   : > { %s575_s7 = scalar_select %p703_p1, %s467_s11, %s47_s24  }
  0x2b   : > { %p583_p8 = por %p705_p6, %p704_p4  ;;  %p307_p9 = scmp.lt.s32.totalorder %s471_s12, 2 }
  0x2c   : > { %s121_s14 = sand.u32 1, %s467_s11   ;;  %p707_p12 = pmov %p704_p4 }
  0x2d   : > { %s276_s18 = sshll.u32 %s121_s14, 3  ;;  %s277_s21 = sshll.u32 %s471_s12, 7 }
  0x2e   : > { %p56_p13 = por %p55_p2, %p707_p12  ;;  %s596_s19 = scalar_lea.hbm %s693_s1, %s277_s21 }
  0x2f   : > { %s125_s23 = scalar_lea.vmem [#allocation5], %s276_s18  ;;  %s122_s27 = scalar_lea.sflag [#allocation6], %s121_s14 }
  0x30   : > { %s132_s24 = sshll.u32 %s125_s23, 4  ;;  %p598_p11 = pnand %p307_p9, %p56_p13  ;;  %s602_s24 = int_to_ptr.vmem [resolvable:$true] %s132_s24 }
  0x31   : > { %s371_s28 = scalar_lea.hbm %s596_s19, 128  ;;  %s376_s3 = scalar_lea.hbm %s693_s1, 256 }
  0x32   : > { %p372_p0 = scmp.ne.s32.totalorder %s596_s19, %s371_s28  ;;  %p373_p3 = pneg %p598_p11 }
  0x33   : > { %p377_p10 = scmp.lt.u32.totalorder %s596_s19, %s693_s1  ;;  %p378_p1 = scmp.lt.u32.totalorder %s376_s3, %s371_s28 }
  0x34   : > { %p374_p5 = pnand %p373_p3, %p372_p0  ;;  %p380_p4 = scmp.lt.u32.totalorder %s371_s28, %s596_s19 }
  0x35   : > { %p379_p2 = por %p378_p1, %p377_p10 }
  0x36   : > { %p375_p7 = pneg %p374_p5 }
  0x37   : > { %p381_p6 = por %p380_p4, %p379_p2 }
  0x39   : > { %p382_p9 = pnand %p381_p6, %p375_p7 }
  0x3b   : > { %385 = shalt.err (!%p382_p9)
}
  0x3c   : > { %s386_s6 = scalar_lea.vmem %s602_s24, 128  ;;  %s474_s14 = smov [#allocation5]  }
  0x3d   : > { %p387_p12 = scmp.ne.s32.totalorder %s602_s24, %s386_s6  ;;  %s391_s18 = sshll.u32 %s474_s14, 4  ;;  %s392_s18 = int_to_ptr.vmem [resolvable:$false] %s391_s18 }
  0x3e   : > { %s393_s21 = scalar_lea.vmem %s392_s18, 256  ;;  %p394_p5 = scmp.lt.s32.totalorder %s602_s24, %s392_s18 }
  0x3f   : > { %p389_p13 = pnand %p387_p12, %p373_p3  ;;  %p395_p10 = scmp.lt.s32.totalorder %s393_s21, %s386_s6 }
  0x41   : > { %p390_p0 = pneg %p389_p13  ;;  %p396_p1 = por %p395_p10, %p394_p5 }
  0x43   : > { %p397_p2 = pnand %p396_p1, %p390_p0 }
  0x45   : > { %400 = shalt.err (!%p397_p2)
}
  0x46   : > { %301 = dma.hbm_to_vmem [thread:$0]  (!%p598_p11), %s596_s19, 128, %s602_s24, %s122_s27  }
  0x47   : > { %p709_p7 = scmp.ne.s32.totalorder %s700_s17, 0 }
  0x48   : > { %p710_p3 = scmp.eq.s32.totalorder (!%p709_p7), %s512_s13, 0 }
  0x49   : > { %141 = sbr.rel (%p709_p7) target bundleno = 110 (0x6e), region = 28 }
  0x50   : > { %446 = dma.done.wait (%p710_p3), [#allocation3], 128   ;;  %p711_p4 = pmov %p710_p3 }
  0x51   : > { %s636_s22 = sand.u32 1, %s463_s10   ;;  %p712_p6 = scmp.ne.s32.totalorder %s698_s15, 0 }
  0x52   : > { %448 = vsyncadd (%p711_p4), [#allocation3], 4294967168  ;;  %s280_s25 = sshll.u32 %s636_s22, 3  ;;  %s148_s23 = scalar_lea.sflag [#allocation6], %s636_s22 }
  0x53   : > { %s151_s26 = scalar_lea.vmem [#allocation5], %s280_s25 }
  0x54   : > { %450 = dma.done.wait (%p712_p6), %s148_s23, 128  }
  0x55   : > { %452 = vsyncadd (%p712_p6), %s148_s23, 4294967168  ;;  %s171_s17 = scalar_lea.vmem [#allocation7], %s280_s25  ;;  %s283_s24 = sshll.u32 %s512_s13, 7  ;;  %v172_v0 = vld [vmem:[%s151_s26] sm:$0xff]  ;;  %v173_v1 = vld [vmem:[#allocation2] sm:$0xff] }
  0x56   : > { %s190_s19 = sshll.u32 %s171_s17, 4  ;;  %v174_v2 = vadd.f32 %v173_v1, %v172_v0  ;;  %s650_s29 = scalar_lea.hbm %s694_s2, %s283_s24  ;;  %s645_s19 = int_to_ptr.vmem [resolvable:$true] %s190_s19 }
  0x57   : > { %s177_s15 = scalar_lea.sflag [#allocation4], %s636_s22  ;;  %s401_s30 = scalar_lea.vmem %s645_s19, 128 }
  0x58   : > { %175 = vst [vmem:[%s171_s17] sm:$0xff] %v174_v2  ;;  %p402_p11 = scmp.ne.s32.totalorder %s645_s19, %s401_s30  ;;  %s475_s13 = smov [#allocation7]  }
  0x59   : > { %s405_s3 = sshll.u32 %s475_s13, 4  ;;  %s406_s3 = int_to_ptr.vmem [resolvable:$false] %s405_s3 }
  0x5a   : > { %p403_p9 = pnand %p402_p11, %p583_p8  ;;  %s407_s4 = scalar_lea.vmem %s406_s3, 256 }
  0x5b   : > { %p408_p13 = scmp.lt.s32.totalorder %s645_s19, %s406_s3  ;;  %p409_p0 = scmp.lt.s32.totalorder %s407_s4, %s401_s30 }
  0x5c   : > { %p404_p12 = pneg %p403_p9 }
  0x5d   : > { %p410_p5 = por %p409_p0, %p408_p13 }
  0x5f   : > { %p411_p10 = pnand %p410_p5, %p404_p12 }
  0x61   : > { %414 = shalt.err (!%p411_p10)
}
  0x62   : > { %s415_s5 = scalar_lea.hbm %s650_s29, 128  ;;  %s419_s18 = scalar_lea.hbm %s694_s2, 256 }
  0x63   : > { %p416_p1 = scmp.ne.s32.totalorder %s650_s29, %s415_s5  ;;  %p420_p3 = scmp.lt.u32.totalorder %s650_s29, %s694_s2 }
  0x64   : > { %p421_p4 = scmp.lt.u32.totalorder %s419_s18, %s415_s5  ;;  %p423_p11 = scmp.lt.u32.totalorder %s415_s5, %s650_s29 }
  0x65   : > { %p417_p2 = pnand %p416_p1, %p583_p8 }
  0x66   : > { %p422_p6 = por %p421_p4, %p420_p3 }
  0x67   : > { %p418_p7 = pneg %p417_p2 }
  0x68   : > { %p424_p9 = por %p423_p11, %p422_p6 }
  0x6a   : > { %p425_p12 = pnand %p424_p9, %p418_p7 }
  0x6c   : > { %428 = shalt.err (!%p425_p12)
}
  0x6d   : > { %292 = dma.vmem_to_hbm [thread:$0]  (%p583_p8), %s645_s19, 128, %s650_s29, %s177_s15  }
  0x6e PF: > { %s202_s25 = sand.u32 1, %s459_s9   ;;  %p713_p13 = scmp.ne.s32.totalorder %s699_s16, 0 }
  0x6f   : > { %p714_p0 = scmp.ge.s32.totalorder %s471_s12, 2  ;;  %s203_s23 = scalar_lea.sflag [#allocation4], %s202_s25 }
  0x71   : > { %p303_p5 = pnand %p714_p0, %p713_p13 }
  0x73   : > { %454 = dma.done.wait (!%p303_p5), %s203_s23, 128  }
  0x74   : > { %456 = vsyncadd (!%p303_p5), %s203_s23, 4294967168  ;;  %p16_p10 = scmp.ge.s32.totalorder %s539_s20, 4   ;;  %s715_s9 = smov %s463_s10 }
  0x75   : > { %s716_s10 = smov %s467_s11  ;;  %s717_s11 = smov %s575_s7 }
  0x76   : > { %s718_s12 = smov %s539_s20  ;;  %18 = sbr.rel (!%p16_p10) target bundleno = 6 (0x6), region = 78 }
  0x7d   :  { %208 = vsyncpa [#allocation3], 1 }
  0x7e   :  { %210 = vsyncpa [#allocation3 + $0x1], 1 }
  0x7f   :  { %211 = vsyncpa [#allocation6], 1 }
  0x80   :  { %213 = vsyncpa [#allocation6 + $0x1], 1 }
  0x81   :  { %214 = vsyncpa [#allocation4], 1 }
  0x82   :  { %216 = vsyncpa [#allocation4 + $0x1], 1 }

// kernel: tpu_custom_call.1
= control target key start
LH: loop header
LB: loop body
LE: loop exit
PB: predicated region body
PF: predicated region fallthrough
CT: control target
= control target key end

     0   :  { %vm51_vm0 = vcmask 1043456   ;;  %vm38_vm1 = vcmask 64512   ;;  %vm136_vm2 = vcmask 261120   ;;  %s288_s1 = inlined_call_operand.vmem [shape: bf16[8,32], index: 1, kind: input, shape index: {}]   ;;  %s289_s0 = inlined_call_operand.vmem [shape: f32[64,8], index: 0, kind: input, shape index: {}]   ;;  %s290_s2 = inlined_call_operand.vmem [shape: f32[1,32], index: 2, kind: input, shape index: {}]   ;;  %s291_s3 = inlined_call_operand.vmem [shape: f32[64,32], index: 3, kind: input, shape index: {}]   ;;  %s292_s4 = inlined_call_operand.vmem [shape: f32[64,32], index: 4, kind: output, shape index: {}]  }
   0x1   :  { %v30_v0 = vld [vmem:[%s288_s1] sm:$0xf]  ;;  %v19_v2 = vld [vmem:[%s289_s0 + $0x8] sm:$0xff]  ;;  %v20_v7 = vld [vmem:[%s289_s0 + $0x10] sm:$0xff] }
   0x2   :  { %v18_v1 = vld [vmem:[%s289_s0] sm:$0xff]  ;;  %171 = vmatprep.subr.msk.bf16.mxu0 %vm51_vm0, %v30_v0  ;;  %172 = vmatprep.subr.msk.bf16.mxu1 %vm51_vm0, %v30_v0  ;;  %v53_v3 = vsel %vm51_vm0, %v30_v0, 0  ;;  %v23_v6 = vld [vmem:[%s289_s0 + $0x28] sm:$0xff]  ;;  %v21_v9 = vld [vmem:[%s289_s0 + $0x18] sm:$0xff] }
   0x3   :  { %v26_v4 = vpack.c.bf16 %v19_v2, %v18_v1  ;;  %v22_v5 = vld [vmem:[%s289_s0 + $0x20] sm:$0xff]  ;;  %160 = vmatpush3.bf16.msra.mxu0 %v53_v3  ;;  %170 = vmatpush3.bf16.msra.mxu1 %v53_v3  ;;  %v24_v10 = vld [vmem:[%s289_s0 + $0x30] sm:$0xff]  ;;  %v25_v11 = vld [vmem:[%s289_s0 + $0x38] sm:$0xff]  ;;  %v27_v12 = vpack.c.bf16 %v21_v9, %v20_v7 }
   0x4   :  { %v28_v8 = vpack.c.bf16 %v23_v6, %v22_v5  ;;  %v29_v13 = vpack.c.bf16 %v25_v11, %v24_v10  ;;  %v149_v14 = vld [vmem:[%s290_s2] ss:$0 sm:$0xff]  ;;  %v122_v16 = vld [vmem:[%s291_s3 + $0x10] sm:$0xff]  ;;  %v123_v28 = vld [vmem:[%s291_s3 + $0x18] sm:$0xff] }
   0x5   :  { %161 = vmatprep.mubr.msk.bf16.mxu0 %vm38_vm1, %v26_v4  ;;  %v126_v18 = vld [vmem:[%s291_s3 + $0x30] sm:$0xff]  ;;  %v120_v22 = vld [vmem:[%s291_s3] sm:$0xff]  ;;  %v127_v30 = vld [vmem:[%s291_s3 + $0x38] sm:$0xff] }
   0x6   :  { %165 = vmatprep.mubr.msk.bf16.mxu1 %vm38_vm1, %v28_v8  ;;  %162 = vmatmul.mubr.msk.bf16.vlgmr.msra.gmra.mrb[0].mxu0 %vm38_vm1, %v27_v12  ;;  %v124_v24 = vld [vmem:[%s291_s3 + $0x20] sm:$0xff]  ;;  %v121_v36 = vld [vmem:[%s291_s3 + $0x8] sm:$0xff] }
   0x7   :  { %166 = vmatmul.mubr.msk.bf16.vlgmr.msra.gmra.mrb[0].mxu1 %vm38_vm1, %v29_v13  ;;  %v125_v38 = vld [vmem:[%s291_s3 + $0x28] sm:$0xff] }
  0xd9   :  { %v163_v15 = vpop.f32.mrb[0].mxu0 }
  0xda   :  { %v167_v17 = vpop.f32.mrb[0].mxu1  ;;  %v98_v19 = vadd.f32 %v163_v15, %v149_v14  ;;  %v89_v21 = vpop.f32.mrb[1].mxu0 }
  0xdb   :  { %v114_v20 = vadd.f32 %v167_v17, %v149_v14  ;;  %v105_v23 = vpop.f32.mrb[1].mxu1  ;;  %v90_v25 = vadd.f32 %v149_v14, %v89_v21  ;;  %v164_v27 = vpop.f32.mrb[2].mxu0 }
  0xdc   :  { %v106_v26 = vadd.f32 %v149_v14, %v105_v23  ;;  %v168_v29 = vpop.f32.mrb[2].mxu1  ;;  %v130_v31 = vadd.f32 %v122_v16, %v98_v19  ;;  %v101_v33 = vadd.f32 %v164_v27, %v149_v14  ;;  %v92_v35 = vpop.f32.mrb[3].mxu0 }
  0xdd   :  { %v134_v32 = vadd.f32 %v126_v18, %v114_v20  ;;  %v117_v34 = vadd.f32 %v168_v29, %v149_v14  ;;  %v108_v37 = vpop.f32.mrb[3].mxu1  ;;  %v128_v39 = vadd.f32 %v120_v22, %v90_v25  ;;  %v93_v41 = vadd.f32 %v149_v14, %v92_v35 }
  0xde   :  { %v132_v40 = vadd.f32 %v124_v24, %v106_v26  ;;  %v109_v42 = vadd.f32 %v149_v14, %v108_v37  ;;  %139 = vst.msk [vmem:[%s292_s4 + $0x10] sm:$0xff] %vm136_vm2, %v130_v31  ;;  %v131_v43 = vadd.f32 %v123_v28, %v101_v33 }
  0xdf   :  { %143 = vst.msk [vmem:[%s292_s4 + $0x30] sm:$0xff] %vm136_vm2, %v134_v32  ;;  %v135_v44 = vadd.f32 %v127_v30, %v117_v34  ;;  %137 = vst.msk [vmem:[%s292_s4] sm:$0xff] %vm136_vm2, %v128_v39  ;;  %v129_v45 = vadd.f32 %v121_v36, %v93_v41 }
  0xe0   :  { %141 = vst.msk [vmem:[%s292_s4 + $0x20] sm:$0xff] %vm136_vm2, %v132_v40  ;;  %v133_v46 = vadd.f32 %v125_v38, %v109_v42  ;;  %140 = vst.msk [vmem:[%s292_s4 + $0x18] sm:$0xff] %vm136_vm2, %v131_v43 }
  0xe1   :  { %144 = vst.msk [vmem:[%s292_s4 + $0x38] sm:$0xff] %vm136_vm2, %v135_v44  ;;  %138 = vst.msk [vmem:[%s292_s4 + $0x8] sm:$0xff] %vm136_vm2, %v129_v45 }
  0xe2   :  { %142 = vst.msk [vmem:[%s292_s4 + $0x28] sm:$0xff] %vm136_vm2, %v133_v46 }

</bundles_post_ra>
